<compile_context>
chip_gen: v5e
topology: v5e:2x2
jax: 0.10.0
libtpu: 0.0.40
codegen_flags: <defaults>
</compile_context>

<pallas_src>
import functools

import jax
import jax.numpy as jnp
from jax.experimental import pallas as pl
from jax.experimental.pallas import tpu as pltpu

NUM_RELATIONS = 1   # R (static; relation loop is unrolled inside the kernel)
LANE = 128          # hidden width is zero-padded to a multiple of this (lane-dense)
ROW_ALIGN = 16      # row-tile quantum (safe for bf16 sublane packing)


def _round_up(x, m):
    return ((x + m - 1) // m) * m


def _vmem_limit_bytes():
    """Per-generation VMEM budget with double-buffering headroom."""
    try:
        cap = pltpu.get_tpu_info().vmem_capacity_bytes  # 128 MiB v5e/v6e, 64 MiB v7x
    except Exception:
        cap = 64 * 1024 * 1024
    return int(min(cap * 3 // 4, 112 * 1024 * 1024))


def _row_tile(n, vmem_limit):
    """Row-tile size so the double-buffered bf16 A row slab fits comfortably."""
    n_al = _round_up(n, ROW_ALIGN)
    budget = vmem_limit // 4                                   # A tile ~1/4 of budget
    tm_cap = budget // max(2 * NUM_RELATIONS * 2 * n_al, 1)    # 2 B/elem * 2 buffers
    tm = max(ROW_ALIGN, min(1024, (tm_cap // ROW_ALIGN) * ROW_ALIGN, n_al))
    n_pad = _round_up(n_al, tm)
    return tm, n_pad


def rgcn_layer_kernel(xt_ref, xf_ref, a_ref, w_ref, b_ref, h_ref, *, fuse):
    """One row tile of  relu( X W_root + b + sum_r A_r (X W_r) ), reordered as (A_r X) W_r.

    xt_ref : [tm, F]        this tile's node features (bf16)
    xf_ref : [N, F]         all node features (bf16) - needed for the aggregation
    a_ref  : [R, tm, N]     normalized adjacency rows (bf16)
    w_ref  : fuse=False -> [R+1, F, H]   (W_root, W_rel_0, ...) as separate matrices
             fuse=True  -> [(R+1)*F, H]  row-stacked [W_root; W_rel_0; ...]
    b_ref  : [1, H]         bias (f32)
    h_ref  : [tm, H]        output tile (bf16)
    """
    x_tile = xt_ref[...]
    x_all = xf_ref[...]

    aggs = []
    for r in range(NUM_RELATIONS):  # static unroll
        # NxN contraction with narrow output width (the big compute saver).
        agg = jnp.dot(a_ref[r], x_all, preferred_element_type=jnp.float32)
        aggs.append(agg.astype(x_all.dtype))

    if fuse:
        # Single fused MXU pass: [x_tile | A_0 x | ...] @ [W_root; W_0; ...]
        m = jnp.concatenate([x_tile] + aggs, axis=-1)
        acc = jnp.dot(m, w_ref[...], preferred_element_type=jnp.float32)
    else:
        acc = jnp.dot(x_tile, w_ref[0], preferred_element_type=jnp.float32)
        for r in range(NUM_RELATIONS):
            acc = acc + jnp.dot(aggs[r], w_ref[r + 1],
                                preferred_element_type=jnp.float32)

    acc = acc + b_ref[...]
    h_ref[...] = jnp.maximum(acc, 0.0).astype(h_ref.dtype)


def pool_head_kernel(p_ref, h_ref, wl_ref, bl_ref, out_ref):
    """global_mean_pool + Linear(H->1) + sigmoid.

    p_ref  : [G, N]   mean-pool matrix (bf16)
    h_ref  : [N, H]   node embeddings (bf16)
    wl_ref : [1, H]   final linear weight as a row (f32, zero-padded)
    bl_ref : [1, 1]   final linear bias (SMEM scalar)
    out_ref: [G, 1]   sigmoid(logits)   (lane-dense [1,G] only worth it for large G)
    """
    pooled = jnp.dot(p_ref[...], h_ref[...], preferred_element_type=jnp.float32)
    # Output-width-1 matmul replaced by VPU multiply + lane reduce (frees an MXU pass).
    logits = jnp.sum(pooled * wl_ref[...], axis=-1, keepdims=True) + bl_ref[0, 0]
    out_ref[...] = jax.nn.sigmoid(logits)


def _rgcn_layer(x, adj, w, b, *, tm, fuse, vmem_limit):
    n_pad, feat = x.shape
    hp = b.shape[1]
    grid = (n_pad // tm,)
    kernel = functools.partial(rgcn_layer_kernel, fuse=fuse)
    return pl.pallas_call(
        kernel,
        out_shape=jax.ShapeDtypeStruct((n_pad, hp), jnp.bfloat16),
        grid=grid,
        in_specs=[
            pl.BlockSpec((tm, feat), lambda i: (i, 0)),                     # X tile
            pl.BlockSpec((n_pad, feat), lambda i: (0, 0)),                  # full X
            pl.BlockSpec((NUM_RELATIONS, tm, n_pad), lambda i: (0, i, 0)),  # A row slab
            pl.BlockSpec(w.shape, lambda i: (0,) * w.ndim),                 # weights
            pl.BlockSpec((1, hp), lambda i: (0, 0)),                        # bias
        ],
        out_specs=pl.BlockSpec((tm, hp), lambda i: (i, 0)),
        compiler_params=pltpu.CompilerParams(
            dimension_semantics=("parallel",),   # independent row tiles -> megacore
            vmem_limit_bytes=vmem_limit),
    )(x, x, adj, w, b)


@functools.partial(jax.jit, static_argnames=("num_graphs",))
def flowgat_forward(x, edge_index, edge_type, batch, params, *, num_graphs):
    """Glue: dense normalized adjacency + pool matrix, then the Pallas kernels."""
    f32, bf16 = jnp.float32, jnp.bfloat16
    n, f_in = x.shape
    hidden = params["w1_root"].shape[1]
    hp = _round_up(hidden, LANE)          # lane-dense hidden width (zero padded)

    vmem_limit = _vmem_limit_bytes()
    tm, n_pad = _row_tile(n, vmem_limit)

    # Dense normalized adjacency per relation (PyG RGCNConv aggr='mean'):
    # A[r, i, j] = 1/|N_r(i)| for edge j -> i of relation r.  Edges with an
    # invalid relation id are dropped explicitly (not silently via OOB scatter).
    valid = (edge_type >= 0) & (edge_type < NUM_RELATIONS)
    rel = jnp.where(valid, edge_type, 0)
    adj = jnp.zeros((NUM_RELATIONS, n_pad, n_pad), f32)
    adj = adj.at[rel, edge_index[1], edge_index[0]].add(valid.astype(f32))
    deg = adj.sum(axis=2, keepdims=True)
    adj = jnp.where(deg > 0, adj / jnp.maximum(deg, 1.0), 0.0).astype(bf16)

    # Mean-pool matrix: P[g, i] = 1/count_g if batch[i] == g (zero for padded nodes).
    onehot = (batch[None, :] == jnp.arange(num_graphs)[:, None]).astype(f32)
    counts = onehot.sum(axis=1, keepdims=True)
    pool = (onehot / jnp.maximum(counts, 1.0))
    pool = jnp.pad(pool, ((0, 0), (0, n_pad - n))).astype(bf16)

    # Lane-dense, zero-padded parameters.
    def pad_h(w):   # pad last dim H -> hp
        return jnp.pad(w, [(0, 0)] * (w.ndim - 1) + [(0, hp - hidden)])

    def pad_hh(w):  # pad both dims of an [H, H] weight -> [hp, hp]
        return jnp.pad(w, ((0, hp - hidden), (0, hp - hidden)))

    # Layer 1: separate matrices [R+1, Fin, hp] (root first).
    w1 = jnp.stack([pad_h(params["w1_root"])]
                   + [pad_h(params["w1_rel"][r]) for r in range(NUM_RELATIONS)],
                   axis=0).astype(bf16)
    b1 = pad_h(params["b1"]).reshape(1, hp).astype(f32)

    # Layer 2: row-stacked [(R+1)*hp, hp] for the fused single-pass matmul.
    w2 = jnp.concatenate([pad_hh(params["w2_root"])]
                         + [pad_hh(params["w2_rel"][r]) for r in range(NUM_RELATIONS)],
                         axis=0).astype(bf16)
    b2 = pad_h(params["b2"]).reshape(1, hp).astype(f32)

    wl = jnp.pad(params["w_lin"][:, 0], (0, hp - hidden)).reshape(1, hp).astype(f32)
    bl = params["b_lin"].reshape(1, 1).astype(f32)

    x_pad = jnp.pad(x.astype(f32), ((0, n_pad - n), (0, 0))).astype(bf16)

    # Two row-tiled RGCN layers (layer 2 needs the full layer-1 output, hence 2 calls).
    h1 = _rgcn_layer(x_pad, adj, w1, b1, tm=tm, fuse=False, vmem_limit=vmem_limit)
    h2 = _rgcn_layer(h1, adj, w2, b2, tm=tm, fuse=True, vmem_limit=vmem_limit)

    out = pl.pallas_call(
        pool_head_kernel,
        out_shape=jax.ShapeDtypeStruct((num_graphs, 1), f32),
        in_specs=[pl.BlockSpec(memory_space=pltpu.MemorySpace.VMEM),
                  pl.BlockSpec(memory_space=pltpu.MemorySpace.VMEM),
                  pl.BlockSpec(memory_space=pltpu.MemorySpace.VMEM),
                  pl.BlockSpec(memory_space=pltpu.MemorySpace.SMEM)],
        out_specs=pl.BlockSpec(memory_space=pltpu.MemorySpace.VMEM),
        compiler_params=pltpu.CompilerParams(vmem_limit_bytes=vmem_limit),
    )(pool, h2, wl, bl)
    return out.squeeze()   # matches torch .squeeze() -> shape [G]


def init_params(key, num_node_features, hidden_dim):
    ks = jax.random.split(key, 8)
    s = 0.1
    return {
        "w1_rel":  s * jax.random.normal(ks[0], (NUM_RELATIONS, num_node_features, hidden_dim), jnp.float32),
        "w1_root": s * jax.random.normal(ks[1], (num_node_features, hidden_dim), jnp.float32),
        "b1":      s * jax.random.normal(ks[2], (hidden_dim,), jnp.float32),
        "w2_rel":  s * jax.random.normal(ks[3], (NUM_RELATIONS, hidden_dim, hidden_dim), jnp.float32),
        "w2_root": s * jax.random.normal(ks[4], (hidden_dim, hidden_dim), jnp.float32),
        "b2":      s * jax.random.normal(ks[5], (hidden_dim,), jnp.float32),
        "w_lin":   s * jax.random.normal(ks[6], (hidden_dim, 1), jnp.float32),
        "b_lin":   s * jax.random.normal(ks[7], (1,), jnp.float32),
    }


if __name__ == "__main__":
    key = jax.random.PRNGKey(0)
    k_x, k_p = jax.random.split(key)

    # Small synthetic batched graph: 2 graphs x 8 nodes, 4 features each.
    num_node_features = 4
    hidden_dim = 32
    nodes_per_graph = 8
    num_graphs = 2
    n = nodes_per_graph * num_graphs

    x = jax.random.normal(k_x, (n, num_node_features), jnp.float32)

    # Directed ring within each graph (edge j -> j+1 mod size, per graph).
    src, dst = [], []
    for g in range(num_graphs):
        base = g * nodes_per_graph
        for j in range(nodes_per_graph):
            src.append(base + j)
            dst.append(base + (j + 1) % nodes_per_graph)
    edge_index = jnp.array([src, dst], dtype=jnp.int32)        # [2, E]
    edge_type = jnp.zeros((edge_index.shape[1],), jnp.int32)   # single relation
    batch = jnp.repeat(jnp.arange(num_graphs, dtype=jnp.int32), nodes_per_graph)

    params = init_params(k_p, num_node_features, hidden_dim)

    out = flowgat_forward(x, edge_index, edge_type, batch, params,
                          num_graphs=num_graphs)
    jax.block_until_ready(out)
    assert out.shape == (num_graphs,)
    assert bool(jnp.all(jnp.isfinite(out)))
    print("KERNEL_OK")
</pallas_src>

<mosaic_0001>
module attributes {stable_mosaic.version = 11 : i64} {
  func.func @rgcn_layer_kernel(%arg0: i32, %arg1: memref<16x4xbf16, #tpu.memory_space<vmem>>, %arg2: memref<16x4xbf16, #tpu.memory_space<vmem>>, %arg3: memref<1x16x16xbf16, #tpu.memory_space<vmem>>, %arg4: memref<2x4x128xbf16, #tpu.memory_space<vmem>>, %arg5: memref<1x128xf32, #tpu.memory_space<vmem>>, %arg6: memref<16x128xbf16, #tpu.memory_space<vmem>>) attributes {dimension_semantics = [#tpu.dimension_semantics<parallel>], iteration_bounds = array<i64: 1>, scalar_prefetch = 0 : i64, scratch_operands = 0 : i64, tpu.core_type = #tpu.core_type<tc>, window_params = [{transform_indices = @transform_0, window_bounds = array<i64: 16, 4>}, {pipeline_mode = #tpu.pipeline_mode<synchronous>, transform_indices = @transform_1, window_bounds = array<i64: 16, 4>}, {transform_indices = @transform_2, window_bounds = array<i64: 1, 16, 16>}, {pipeline_mode = #tpu.pipeline_mode<synchronous>, transform_indices = @transform_3, window_bounds = array<i64: 2, 4, 128>}, {pipeline_mode = #tpu.pipeline_mode<synchronous>, transform_indices = @transform_4, window_bounds = array<i64: 1, 128>}, {transform_indices = @transform_5, window_bounds = array<i64: 16, 128>}]} {
    %c0 = arith.constant 0 : index
    %c0_0 = arith.constant 0 : index
    %0 = vector.load %arg1[%c0, %c0_0] : memref<16x4xbf16, #tpu.memory_space<vmem>>, vector<16x4xbf16>
    %c0_1 = arith.constant 0 : index
    %c0_2 = arith.constant 0 : index
    %1 = vector.load %arg2[%c0_1, %c0_2] : memref<16x4xbf16, #tpu.memory_space<vmem>>, vector<16x4xbf16>
    %c0_3 = arith.constant 0 : index
    %c0_4 = arith.constant 0 : index
    %c0_5 = arith.constant 0 : index
    %2 = vector.load %arg3[%c0_3, %c0_4, %c0_5] : memref<1x16x16xbf16, #tpu.memory_space<vmem>>, vector<1x16x16xbf16>
    %3 = vector.shape_cast %2 : vector<1x16x16xbf16> to vector<16x16xbf16>
    %cst = arith.constant dense<0.000000e+00> : vector<16x4xf32>
    %4 = tpu.matmul %3, %1, %cst {dimension_numbers = #tpu.dot_dimension_numbers<[1], [0], [0], [1], [0, 0, 1, 1], [], []>} : vector<16x16xbf16>, vector<16x4xbf16>, vector<16x4xf32> -> vector<16x4xf32>
    %5 = arith.truncf %4 : vector<16x4xf32> to vector<16x4xbf16>
    %c0_6 = arith.constant 0 : index
    %c0_7 = arith.constant 0 : index
    %c0_8 = arith.constant 0 : index
    %6 = vector.load %arg4[%c0_6, %c0_7, %c0_8] : memref<2x4x128xbf16, #tpu.memory_space<vmem>>, vector<1x4x128xbf16>
    %7 = vector.shape_cast %6 : vector<1x4x128xbf16> to vector<4x128xbf16>
    %cst_9 = arith.constant dense<0.000000e+00> : vector<16x128xf32>
    %8 = tpu.matmul %0, %7, %cst_9 {dimension_numbers = #tpu.dot_dimension_numbers<[1], [0], [0], [1], [0, 0, 1, 1], [], []>} : vector<16x4xbf16>, vector<4x128xbf16>, vector<16x128xf32> -> vector<16x128xf32>
    %c1 = arith.constant 1 : index
    %c0_10 = arith.constant 0 : index
    %c0_11 = arith.constant 0 : index
    %9 = vector.load %arg4[%c1, %c0_10, %c0_11] : memref<2x4x128xbf16, #tpu.memory_space<vmem>>, vector<1x4x128xbf16>
    %10 = vector.shape_cast %9 : vector<1x4x128xbf16> to vector<4x128xbf16>
    %cst_12 = arith.constant dense<0.000000e+00> : vector<16x128xf32>
    %11 = tpu.matmul %5, %10, %cst_12 {dimension_numbers = #tpu.dot_dimension_numbers<[1], [0], [0], [1], [0, 0, 1, 1], [], []>} : vector<16x4xbf16>, vector<4x128xbf16>, vector<16x128xf32> -> vector<16x128xf32>
    %12 = arith.addf %8, %11 : vector<16x128xf32>
    %c0_13 = arith.constant 0 : index
    %c0_14 = arith.constant 0 : index
    %13 = vector.load %arg5[%c0_13, %c0_14] : memref<1x128xf32, #tpu.memory_space<vmem>>, vector<1x128xf32>
    %14 = vector.broadcast %13 : vector<1x128xf32> to vector<16x128xf32>
    %15 = arith.addf %12, %14 : vector<16x128xf32>
    %cst_15 = arith.constant 0.000000e+00 : f32
    %16 = vector.broadcast %cst_15 : f32 to vector<16x128xf32>
    %17 = arith.maximumf %15, %16 : vector<16x128xf32>
    %18 = arith.truncf %17 : vector<16x128xf32> to vector<16x128xbf16>
    %c0_16 = arith.constant 0 : index
    %c0_17 = arith.constant 0 : index
    %19 = vector.load %arg6[%c0_16, %c0_17] : memref<16x128xbf16, #tpu.memory_space<vmem>>, vector<16x128xbf16>
    tpu.vector_store %arg6[%c0_16, %c0_17], %18 {strides = array<i32>} : memref<16x128xbf16, #tpu.memory_space<vmem>>, vector<16x128xbf16>,
    return
  }
  func.func @transform_0(%arg0: i32) -> (i32, i32) {
    %c0_i32 = arith.constant 0 : i32
    %c0_i32_0 = arith.constant 0 : i32
    return %arg0, %c0_i32 : i32, i32
  }
  func.func @transform_1(%arg0: i32) -> (i32, i32) {
    %c0_i32 = arith.constant 0 : i32
    %c0_i32_0 = arith.constant 0 : i32
    %c0_i32_1 = arith.constant 0 : i32
    return %c0_i32, %c0_i32_0 : i32, i32
  }
  func.func @transform_2(%arg0: i32) -> (i32, i32, i32) {
    %c0_i32 = arith.constant 0 : i32
    %c0_i32_0 = arith.constant 0 : i32
    %c0_i32_1 = arith.constant 0 : i32
    return %c0_i32, %arg0, %c0_i32_0 : i32, i32, i32
  }
  func.func @transform_3(%arg0: i32) -> (i32, i32, i32) {
    %c0_i32 = arith.constant 0 : i32
    %c0_i32_0 = arith.constant 0 : i32
    %c0_i32_1 = arith.constant 0 : i32
    %c0_i32_2 = arith.constant 0 : i32
    return %c0_i32, %c0_i32_0, %c0_i32_1 : i32, i32, i32
  }
  func.func @transform_4(%arg0: i32) -> (i32, i32) {
    %c0_i32 = arith.constant 0 : i32
    %c0_i32_0 = arith.constant 0 : i32
    %c0_i32_1 = arith.constant 0 : i32
    return %c0_i32, %c0_i32_0 : i32, i32
  }
  func.func @transform_5(%arg0: i32) -> (i32, i32) {
    %c0_i32 = arith.constant 0 : i32
    %c0_i32_0 = arith.constant 0 : i32
    return %arg0, %c0_i32 : i32, i32
  }
}

module attributes {stable_mosaic.version = 11 : i64} {
  func.func @rgcn_layer_kernel(%arg0: i32, %arg1: memref<16x128xbf16, #tpu.memory_space<vmem>>, %arg2: memref<16x128xbf16, #tpu.memory_space<vmem>>, %arg3: memref<1x16x16xbf16, #tpu.memory_space<vmem>>, %arg4: memref<256x128xbf16, #tpu.memory_space<vmem>>, %arg5: memref<1x128xf32, #tpu.memory_space<vmem>>, %arg6: memref<16x128xbf16, #tpu.memory_space<vmem>>) attributes {dimension_semantics = [#tpu.dimension_semantics<parallel>], iteration_bounds = array<i64: 1>, scalar_prefetch = 0 : i64, scratch_operands = 0 : i64, tpu.core_type = #tpu.core_type<tc>, window_params = [{transform_indices = @transform_0, window_bounds = array<i64: 16, 128>}, {pipeline_mode = #tpu.pipeline_mode<synchronous>, transform_indices = @transform_1, window_bounds = array<i64: 16, 128>}, {transform_indices = @transform_2, window_bounds = array<i64: 1, 16, 16>}, {pipeline_mode = #tpu.pipeline_mode<synchronous>, transform_indices = @transform_3, window_bounds = array<i64: 256, 128>}, {pipeline_mode = #tpu.pipeline_mode<synchronous>, transform_indices = @transform_4, window_bounds = array<i64: 1, 128>}, {transform_indices = @transform_5, window_bounds = array<i64: 16, 128>}]} {
    %c0 = arith.constant 0 : index
    %c0_0 = arith.constant 0 : index
    %0 = vector.load %arg1[%c0, %c0_0] : memref<16x128xbf16, #tpu.memory_space<vmem>>, vector<16x128xbf16>
    %c0_1 = arith.constant 0 : index
    %c0_2 = arith.constant 0 : index
    %1 = vector.load %arg2[%c0_1, %c0_2] : memref<16x128xbf16, #tpu.memory_space<vmem>>, vector<16x128xbf16>
    %c0_3 = arith.constant 0 : index
    %c0_4 = arith.constant 0 : index
    %c0_5 = arith.constant 0 : index
    %2 = vector.load %arg3[%c0_3, %c0_4, %c0_5] : memref<1x16x16xbf16, #tpu.memory_space<vmem>>, vector<1x16x16xbf16>
    %3 = vector.shape_cast %2 : vector<1x16x16xbf16> to vector<16x16xbf16>
    %cst = arith.constant dense<0.000000e+00> : vector<16x128xf32>
    %4 = tpu.matmul %3, %1, %cst {dimension_numbers = #tpu.dot_dimension_numbers<[1], [0], [0], [1], [0, 0, 1, 1], [], []>} : vector<16x16xbf16>, vector<16x128xbf16>, vector<16x128xf32> -> vector<16x128xf32>
    %5 = arith.truncf %4 : vector<16x128xf32> to vector<16x128xbf16>
    %6 = tpu.concatenate %0, %5 in 1 : vector<16x128xbf16>, vector<16x128xbf16> -> vector<16x256xbf16>
    %c0_6 = arith.constant 0 : index
    %c0_7 = arith.constant 0 : index
    %7 = vector.load %arg4[%c0_6, %c0_7] : memref<256x128xbf16, #tpu.memory_space<vmem>>, vector<256x128xbf16>
    %cst_8 = arith.constant dense<0.000000e+00> : vector<16x128xf32>
    %8 = tpu.matmul %6, %7, %cst_8 {dimension_numbers = #tpu.dot_dimension_numbers<[1], [0], [0], [1], [0, 0, 1, 1], [], []>} : vector<16x256xbf16>, vector<256x128xbf16>, vector<16x128xf32> -> vector<16x128xf32>
    %c0_9 = arith.constant 0 : index
    %c0_10 = arith.constant 0 : index
    %9 = vector.load %arg5[%c0_9, %c0_10] : memref<1x128xf32, #tpu.memory_space<vmem>>, vector<1x128xf32>
    %10 = vector.broadcast %9 : vector<1x128xf32> to vector<16x128xf32>
    %11 = arith.addf %8, %10 : vector<16x128xf32>
    %cst_11 = arith.constant 0.000000e+00 : f32
    %12 = vector.broadcast %cst_11 : f32 to vector<16x128xf32>
    %13 = arith.maximumf %11, %12 : vector<16x128xf32>
    %14 = arith.truncf %13 : vector<16x128xf32> to vector<16x128xbf16>
    %c0_12 = arith.constant 0 : index
    %c0_13 = arith.constant 0 : index
    %15 = vector.load %arg6[%c0_12, %c0_13] : memref<16x128xbf16, #tpu.memory_space<vmem>>, vector<16x128xbf16>
    tpu.vector_store %arg6[%c0_12, %c0_13], %14 {strides = array<i32>} : memref<16x128xbf16, #tpu.memory_space<vmem>>, vector<16x128xbf16>,
    return
  }
  func.func @transform_0(%arg0: i32) -> (i32, i32) {
    %c0_i32 = arith.constant 0 : i32
    %c0_i32_0 = arith.constant 0 : i32
    return %arg0, %c0_i32 : i32, i32
  }
  func.func @transform_1(%arg0: i32) -> (i32, i32) {
    %c0_i32 = arith.constant 0 : i32
    %c0_i32_0 = arith.constant 0 : i32
    %c0_i32_1 = arith.constant 0 : i32
    return %c0_i32, %c0_i32_0 : i32, i32
  }
  func.func @transform_2(%arg0: i32) -> (i32, i32, i32) {
    %c0_i32 = arith.constant 0 : i32
    %c0_i32_0 = arith.constant 0 : i32
    %c0_i32_1 = arith.constant 0 : i32
    return %c0_i32, %arg0, %c0_i32_0 : i32, i32, i32
  }
  func.func @transform_3(%arg0: i32) -> (i32, i32) {
    %c0_i32 = arith.constant 0 : i32
    %c0_i32_0 = arith.constant 0 : i32
    %c0_i32_1 = arith.constant 0 : i32
    return %c0_i32, %c0_i32_0 : i32, i32
  }
  func.func @transform_4(%arg0: i32) -> (i32, i32) {
    %c0_i32 = arith.constant 0 : i32
    %c0_i32_0 = arith.constant 0 : i32
    %c0_i32_1 = arith.constant 0 : i32
    return %c0_i32, %c0_i32_0 : i32, i32
  }
  func.func @transform_5(%arg0: i32) -> (i32, i32) {
    %c0_i32 = arith.constant 0 : i32
    %c0_i32_0 = arith.constant 0 : i32
    return %arg0, %c0_i32 : i32, i32
  }
}

module attributes {stable_mosaic.version = 11 : i64} {
  func.func @pool_head_kernel(%arg0: memref<2x16xbf16, #tpu.memory_space<vmem>>, %arg1: memref<16x128xbf16, #tpu.memory_space<vmem>>, %arg2: memref<1x128xf32, #tpu.memory_space<vmem>>, %arg3: memref<1x1xf32, #tpu.memory_space<smem>>, %arg4: memref<2x1xf32, #tpu.memory_space<vmem>>) attributes {dimension_semantics = [], scalar_prefetch = 0 : i64, scratch_operands = 0 : i64, tpu.core_type = #tpu.core_type<tc>} {
    %c0 = arith.constant 0 : index
    %c0_0 = arith.constant 0 : index
    %0 = vector.load %arg0[%c0, %c0_0] : memref<2x16xbf16, #tpu.memory_space<vmem>>, vector<2x16xbf16>
    %c0_1 = arith.constant 0 : index
    %c0_2 = arith.constant 0 : index
    %1 = vector.load %arg1[%c0_1, %c0_2] : memref<16x128xbf16, #tpu.memory_space<vmem>>, vector<16x128xbf16>
    %cst = arith.constant dense<0.000000e+00> : vector<2x128xf32>
    %2 = tpu.matmul %0, %1, %cst {dimension_numbers = #tpu.dot_dimension_numbers<[1], [0], [0], [1], [0, 0, 1, 1], [], []>} : vector<2x16xbf16>, vector<16x128xbf16>, vector<2x128xf32> -> vector<2x128xf32>
    %c0_3 = arith.constant 0 : index
    %c0_4 = arith.constant 0 : index
    %3 = vector.load %arg2[%c0_3, %c0_4] : memref<1x128xf32, #tpu.memory_space<vmem>>, vector<1x128xf32>
    %4 = vector.broadcast %3 : vector<1x128xf32> to vector<2x128xf32>
    %5 = arith.mulf %2, %4 : vector<2x128xf32>
    %cst_5 = arith.constant dense<0.000000e+00> : vector<2xf32>
    %6 = vector.multi_reduction <add>, %5, %cst_5 [1] : vector<2x128xf32> to vector<2xf32>
    %7 = vector.shape_cast %6 : vector<2xf32> to vector<2x1xf32>
    %c0_6 = arith.constant 0 : index
    %c0_7 = arith.constant 0 : index
    %8 = memref.load %arg3[%c0_6, %c0_7] : memref<1x1xf32, #tpu.memory_space<smem>>
    %9 = vector.broadcast %8 : f32 to vector<2x1xf32>
    %10 = arith.addf %7, %9 : vector<2x1xf32>
    %11 = arith.negf %10 : vector<2x1xf32>
    %12 = math.exp %11 : vector<2x1xf32>
    %cst_8 = arith.constant 1.000000e+00 : f32
    %13 = vector.broadcast %cst_8 : f32 to vector<2x1xf32>
    %14 = arith.addf %13, %12 : vector<2x1xf32>
    %15 = arith.divf %13, %14 : vector<2x1xf32>
    %c0_9 = arith.constant 0 : index
    %c0_10 = arith.constant 0 : index
    %16 = vector.load %arg4[%c0_9, %c0_10] : memref<2x1xf32, #tpu.memory_space<vmem>>, vector<2x1xf32>
    tpu.vector_store %arg4[%c0_9, %c0_10], %15 {strides = array<i32>} : memref<2x1xf32, #tpu.memory_space<vmem>>, vector<2x1xf32>,
    return
  }
}

</mosaic_0001>

<bundles_post_ra>
// kernel: flowgat_forward.3
= control target key start
LH: loop header
LB: loop body
LE: loop exit
PB: predicated region body
PF: predicated region fallthrough
CT: control target
= control target key end

     0   :  { %vm64_vm0 = vcmask 1041408   ;;  %vm38_vm1 = vcmask 130048   ;;  %vm60_vm2 = vcmask 31744   ;;  %s199_s1 = inlined_call_operand.vmem [shape: bf16[16,4], index: 1, kind: input, shape index: {}, may-alias: {0,1}]   ;;  %s200_s2 = inlined_call_operand.vmem [shape: bf16[1,16,16], index: 2, kind: input, shape index: {}]   ;;  %s201_s3 = inlined_call_operand.vmem [shape: bf16[2,4,128], index: 3, kind: input, shape index: {}]   ;;  %s202_s0 = inlined_call_operand.vmem [shape: bf16[16,4], index: 0, kind: input, shape index: {}, may-alias: {0,1}]   ;;  %s203_s4 = inlined_call_operand.vmem [shape: f32[1,128], index: 4, kind: input, shape index: {}]   ;;  %s204_s5 = inlined_call_operand.vmem [shape: bf16[16,128], index: 5, kind: output, shape index: {}]  }
   0x1   :  { %v140_v0 = vld [vmem:[%s199_s1] sm:$0xff] }
   0x2   :  { %v57_v1 = vld [vmem:[%s201_s3] sm:$0x3]  ;;  %49 = vmatpush.bf16.msra.mxu0 %v140_v0  ;;  %v132_v5 = vld [vmem:[%s201_s3 + $0x2] sm:$0x3] }
   0x3   :  { %v141_v2 = vld [vmem:[%s200_s2] sm:$0xff]  ;;  %v91_v3 = vsel %vm64_vm0, %v57_v1, 0  ;;  %v66_v6 = vsel %vm64_vm0, %v132_v5, 0 }
   0x4   :  { %v139_v4 = vld [vmem:[%s202_s0] sm:$0xff]  ;;  %100 = vmatpush.bf16.msra.mxu2 %v91_v3  ;;  %75 = vmatpush.bf16.msra.mxu1 %v66_v6 }
   0x5   :  { %131 = vmatmul.msk.bf16.vlgmr.msra.gmra.mxu0 %vm38_vm1, %v141_v2  ;;  %v147_v13 = vld [vmem:[%s203_s4] ss:$0 sm:$0xff] }
   0x7   :  { %138 = vmatmul.msk.bf16.vlgmr.msra.gmra.mxu2 %vm60_vm2, %v139_v4 }
  0x82   :  { %v51_v7 = vpop.f32.mrf.mxu0 }
  0x8a   :  { %v53_v8 = vpop.f32.mrf.mxu0  ;;  %v102_v10 = vpop.f32.mrf.mxu2 }
  0x8b   :  { %v56_v9 = vpack.c.bf16 %v53_v8, %v51_v7 }
  0x8d   :  { %133 = vmatmul.msk.bf16.vlgmr.msra.gmra.mxu1 %vm60_vm2, %v56_v9 }
  0x92   :  { %v104_v14 = vpop.f32.mrf.mxu2 }
 0x10a   :  { %v77_v11 = vpop.f32.mrf.mxu1 }
 0x10b   :  { %v103_v12 = vadd.f32 %v102_v10, %v77_v11 }
 0x10d   :  { %v111_v16 = vadd.f32 %v147_v13, %v103_v12 }
 0x10f   :  { %v113_v19 = vmax.f32 %v111_v16, 0.0 }
 0x112   :  { %v79_v15 = vpop.f32.mrf.mxu1 }
 0x113   :  { %v105_v17 = vadd.f32 %v104_v14, %v79_v15 }
 0x115   :  { %v112_v18 = vadd.f32 %v147_v13, %v105_v17 }
 0x117   :  { %v114_v20 = vmax.f32 %v112_v18, 0.0 }
 0x119   :  { %v145_v21 = vpack.c.bf16 %v114_v20, %v113_v19 }
 0x11b   :  { %146 = vst [vmem:[%s204_s5] sm:$0xff] %v145_v21  }

// kernel: flowgat_forward.4
= control target key start
LH: loop header
LB: loop body
LE: loop exit
PB: predicated region body
PF: predicated region fallthrough
CT: control target
= control target key end

     0   :  { %vm38_vm0 = vcmask 130048   ;;  %s435_s1 = inlined_call_operand.vmem [shape: bf16[16,128], index: 1, kind: input, shape index: {}, may-alias: {0,1}]   ;;  %s436_s2 = inlined_call_operand.vmem [shape: bf16[1,16,16], index: 2, kind: input, shape index: {}]   ;;  %s437_s3 = inlined_call_operand.vmem [shape: bf16[256,128], index: 3, kind: input, shape index: {}]   ;;  %s438_s4 = inlined_call_operand.vmem [shape: f32[1,128], index: 4, kind: input, shape index: {}]   ;;  %s439_s0 = inlined_call_operand.vmem [shape: bf16[16,128], index: 0, kind: input, shape index: {}, may-alias: {0,1}]   ;;  %s440_s5 = inlined_call_operand.vmem [shape: bf16[16,128], index: 5, kind: output, shape index: {}]  }
   0x1   :  { %v318_v0 = vld [vmem:[%s435_s1] sm:$0xff]  ;;  %v327_v1 = vld [vmem:[%s437_s3 + $0x38] sm:$0xff]  ;;  %v326_v4 = vld [vmem:[%s437_s3 + $0x30] sm:$0xff] }
   0x2   :  { %v319_v2 = vld [vmem:[%s436_s2] sm:$0xff]  ;;  %v335_v3 = vld [vmem:[%s437_s3 + $0x78] sm:$0xff]  ;;  %49 = vmatpush.bf16.msra.mxu0 %v318_v0  ;;  %202 = vmatpush.bf16.msra.mxu1 %v327_v1  ;;  %v334_v5 = vld [vmem:[%s437_s3 + $0x70] sm:$0xff] }
   0x3   :  { %216 = vmatpush.bf16.msra.mxu2 %v335_v3  ;;  %v325_v6 = vld [vmem:[%s437_s3 + $0x28] sm:$0xff]  ;;  %v324_v8 = vld [vmem:[%s437_s3 + $0x20] sm:$0xff]  ;;  %v323_v10 = vld [vmem:[%s437_s3 + $0x18] sm:$0xff] }
   0x4   :  { %v333_v7 = vld [vmem:[%s437_s3 + $0x68] sm:$0xff]  ;;  %v332_v9 = vld [vmem:[%s437_s3 + $0x60] sm:$0xff]  ;;  %v322_v11 = vld [vmem:[%s437_s3 + $0x10] sm:$0xff] }
   0x5   :  { %248 = vmatmul.msk.bf16.vlgmr.msra.gmra.mxu0 %vm38_vm0, %v319_v2  ;;  %v331_v12 = vld [vmem:[%s437_s3 + $0x58] sm:$0xff]  ;;  %v321_v13 = vld [vmem:[%s437_s3 + $0x8] sm:$0xff]  ;;  %v330_v14 = vld [vmem:[%s437_s3 + $0x50] sm:$0xff] }
   0x6   :  { %203 = vmatpush.bf16.msra.mxu1 %v326_v4  ;;  %v320_v15 = vld [vmem:[%s437_s3] sm:$0xff]  ;;  %v329_v16 = vld [vmem:[%s437_s3 + $0x48] sm:$0xff] }
   0x7   :  { %217 = vmatpush.bf16.msra.mxu2 %v334_v5  ;;  %v317_v17 = vld [vmem:[%s439_s0] sm:$0xff] }
   0x8   :  { %v328_v18 = vld [vmem:[%s437_s3 + $0x40] sm:$0xff] }
   0x9   :  { %v341_v27 = vld [vmem:[%s438_s4] ss:$0 sm:$0xff] }
   0xa   :  { %204 = vmatpush.bf16.msra.mxu1 %v325_v6 }
   0xb   :  { %218 = vmatpush.bf16.msra.mxu2 %v333_v7 }
   0xe   :  { %205 = vmatpush.bf16.msra.mxu1 %v324_v8 }
   0xf   :  { %219 = vmatpush.bf16.msra.mxu2 %v332_v9 }
  0x12   :  { %206 = vmatpush.bf16.msra.mxu1 %v323_v10 }
  0x13   :  { %220 = vmatpush.bf16.msra.mxu2 %v331_v12 }
  0x16   :  { %207 = vmatpush.bf16.msra.mxu1 %v322_v11 }
  0x17   :  { %221 = vmatpush.bf16.msra.mxu2 %v330_v14 }
  0x1a   :  { %208 = vmatpush.bf16.msra.mxu1 %v321_v13 }
  0x1b   :  { %222 = vmatpush.bf16.msra.mxu2 %v329_v16 }
  0x1e   :  { %209 = vmatpush.bf16.msra.mxu1 %v320_v15 }
  0x1f   :  { %223 = vmatpush.bf16.msra.mxu2 %v328_v18 }
  0x21   :  { %210 = vmatmul.bf16.vlgmr.msra.gmra.mxu1 %v317_v17 }
  0x82   :  { %v51_v19 = vpop.f32.mrf.mxu0 }
  0x83   :  { %v56_v20 = vpack.c.bf16 %v51_v19, %v51_v19 }
  0x85   :  { %v66_v23 = vunpack.c.l.b16 %v56_v20 }
  0x8a   :  { %v53_v21 = vpop.f32.mrf.mxu0 }
  0x8b   :  { %v57_v22 = vpack.c.bf16 %v53_v21, %v53_v21 }
  0x8d   :  { %v67_v24 = vunpack.c.l.b16 %v57_v22 }
  0x8f   :  { %v68_v25 = vpack.c.b16 %v67_v24, %v66_v23 }
  0x91   :  { %224 = vmatmul.bf16.vlgmr.msra.gmra.mxu2 %v68_v25 }
  0x9e   :  { %v211_v26 = vpop.f32.mrf.mxu1 }
  0x9f   :  { %v212_v29 = vadd.f32 %v341_v27, %v211_v26 }
  0xa6   :  { %v213_v30 = vpop.f32.mrf.mxu1 }
  0xa7   :  { %v214_v31 = vadd.f32 %v341_v27, %v213_v30 }
 0x114   :  { %v225_v28 = vpop.f32.mrf.mxu2 }
 0x115   :  { %v226_v32 = vadd.f32 %v225_v28, %v212_v29 }
 0x117   :  { %v230_v35 = vmax.f32 %v226_v32, 0.0 }
 0x11c   :  { %v227_v33 = vpop.f32.mrf.mxu2 }
 0x11d   :  { %v228_v34 = vadd.f32 %v227_v33, %v214_v31 }
 0x11f   :  { %v231_v36 = vmax.f32 %v228_v34, 0.0 }
 0x121   :  { %v339_v37 = vpack.c.bf16 %v231_v36, %v230_v35 }
 0x123   :  { %340 = vst [vmem:[%s440_s5] sm:$0xff] %v339_v37  }

// kernel: flowgat_forward.5
= control target key start
LH: loop header
LB: loop body
LE: loop exit
PB: predicated region body
PF: predicated region fallthrough
CT: control target
= control target key end

     0   :  { %vm28_vm0 = vcmask 130048   ;;  %vm50_vm1 = vcmask 1041408   ;;  %vm76_vm5 = vcmask 1024   ;;  %s134_s1 = inlined_call_operand.vmem [shape: bf16[16,128], index: 1, kind: input, shape index: {}]   ;;  %s135_s0 = inlined_call_operand.vmem [shape: bf16[2,16], index: 0, kind: input, shape index: {}]   ;;  %s136_s2 = inlined_call_operand.vmem [shape: f32[1,128], index: 2, kind: input, shape index: {}]   ;;  %s137_s3 = inlined_call_operand.<no memory space> [shape: f32[1,1], index: 3, kind: input, shape index: {}]   ;;  %s138_s4 = inlined_call_operand.vmem [shape: f32[2,1], index: 4, kind: output, shape index: {}]  }
   0x1   :  { %v88_v0 = vld [vmem:[%s134_s1] sm:$0xff]  ;;  %v55_v7 = vstv %s137_s3 }
   0x2   :  { %39 = vmatpush.bf16.msra.mxu0 %v88_v0  ;;  %v19_v1 = vld [vmem:[%s135_s0] sm:$0x1] }
   0x3   :  { %v89_v2 = vld [vmem:[%s136_s2] ss:$0 sm:$0xff] }
   0x5   :  { %86 = vmatmul.msk.bf16.vlgmr.msra.gmra.mxu0 %vm28_vm0, %v19_v1 }
  0x82   :  { %v41_v3 = vpop.f32.mrf.mxu0 }
  0x83   :  { %v49_v4 = vmul.f32 %v89_v2, %v41_v3 }
  0x85   :  { %v51_v5 = vsel %vm50_vm1, %v49_v4, 0.0 }
  0x86   :  { %52 = vadd.xlane.f32.xlu0 %v51_v5 }
  0x8a   :  { %v43_v6 = vpop.f32.mrf.mxu0 }
  0xf9   :  { %v53_v8 = vpop.xlane.xlu0 %52 }
  0xfa   :  { %v56_v9 = vadd.f32 %v55_v7, %v53_v8 }
  0xfc   :  { %v87_v10 = vmul.f32 -1.442695, %v56_v9 }
  0xfe   :  { %90 = vpow2.f32 %v87_v10 }
 0x104   :  { %v91_v11 = vpop.eup %90 }
 0x105   :  { %v60_v12 = vadd.f32 1.0, %v91_v11 }
 0x107   :  { %92 = vrcp.f32 %v60_v12  ;;  %v72_v16 = vand.u32 2147483648, %v60_v12  ;;  %v70_v18 = vand.u32 2147483647, %v60_v12  ;;  %vm66_vm3 = vweird.f32 %v60_v12 }
 0x109   :  { %v73_v20 = vor.u32 1.1754944e-38, %v72_v16  ;;  %vm71_vm6 = vcmp.eq.f32.partialorder %v70_v18, 8.507059e+37 }
 0x10d   :  { %v93_v13 = vpop.eup %92 }
 0x10e   :  { %v62_v14 = vmul.f32 %v93_v13, %v60_v12  ;;  %vm67_vm2 = vweird.f32 %v93_v13 }
 0x10f   :  { %vm68_vm4 = vmor %vm66_vm3, %vm67_vm2 }
 0x110   :  { %v63_v15 = vsub.f32 1.0, %v62_v14 }
 0x112   :  { %v64_v17 = vmul.f32 %v93_v13, %v63_v15 }
 0x114   :  { %v65_v19 = vadd.f32 %v93_v13, %v64_v17 }
 0x116   :  { %v69_v21 = vsel %vm68_vm4, %v93_v13, %v65_v19 }
 0x117   :  { %v74_v22 = vsel %vm71_vm6, %v73_v20, %v69_v21 }
 0x118   :  { %77 = vst.msk [vmem:[%s138_s4] sm:$0x3] %vm76_vm5, %v74_v22 }

</bundles_post_ra>
